<compile_context>
chip_gen: v7x
topology: tpu7x:2x2x1
jax: 0.10.0
libtpu: 0.0.40
codegen_flags: <defaults>
</compile_context>

<pallas_src>
import jax
import jax.numpy as jnp
from jax.experimental import pallas as pl
from jax.experimental.pallas import tpu as pltpu


def coxph_loss_kernel(x_ref, o_ref, m_sc, s_sc, num_sc, tri_sc, low_sc):
    # x_ref:   (2, S, 128) block: row 0 = sorted risk, row 1 = sorted events
    # o_ref:   (1, 1) numerator output (written on the last step only)
    # m_sc:    (1, 1) carried running max over everything seen so far
    # s_sc:    (1, 1) carried running sum of exp(r - m) over everything seen
    # num_sc:  (1, 1) accumulator for sum((r - logcumsumexp(r)) * events)
    # tri_sc:  (128, 128) resident upper-triangular ones (within-row cumsum)
    # low_sc:  (S, S)     resident strictly-lower-triangular ones (row prefix)
    step = pl.program_id(0)
    s_rows = low_sc.shape[0]
    lanes = tri_sc.shape[0]

    @pl.when(step == 0)
    def _init():
        m_sc[...] = jnp.full_like(m_sc, -jnp.inf)
        s_sc[...] = jnp.zeros_like(s_sc)
        num_sc[...] = jnp.zeros_like(num_sc)
        # Loop-invariant triangular constants: built once, kept resident.
        r_i = jax.lax.broadcasted_iota(jnp.int32, (lanes, lanes), 0)
        c_i = jax.lax.broadcasted_iota(jnp.int32, (lanes, lanes), 1)
        tri_sc[...] = (r_i <= c_i).astype(jnp.float32)        # inclusive
        r_s = jax.lax.broadcasted_iota(jnp.int32, (s_rows, s_rows), 0)
        c_s = jax.lax.broadcasted_iota(jnp.int32, (s_rows, s_rows), 1)
        low_sc[...] = (c_s < r_s).astype(jnp.float32)         # strictly lower

    r = x_ref[0]                     # (S, 128) risk, row-major element order
    e = x_ref[1]                     # (S, 128) events

    # Block max (XLU) and exp (EUP).
    bm = jnp.max(jnp.max(r, axis=1, keepdims=True), axis=0, keepdims=True)  # (1,1)
    p = jnp.exp(r - bm)                                                     # (S,128)

    # Hierarchical within-block inclusive cumsum of p (row-major order):
    #   within-row cumsum via MXU, across-row exclusive prefix via tiny MXU.
    c_row = jnp.dot(p, tri_sc[...], preferred_element_type=jnp.float32)     # (S,128)
    row_sum = jnp.sum(p, axis=1, keepdims=True)                             # (S,1)
    row_sum_b = jnp.broadcast_to(row_sum, (s_rows, lanes))                  # (S,128)
    row_prefix = jnp.dot(low_sc[...], row_sum_b,
                         preferred_element_type=jnp.float32)                # (S,128)
    c_total = c_row + row_prefix                                            # (S,128)

    # Online (flash-style) combine with the carried cross-block prefix.
    m_prev = m_sc[...]                                                      # (1,1)
    s_prev = s_sc[...]                                                      # (1,1)
    m_new = jnp.maximum(m_prev, bm)
    a_prev = jnp.exp(m_prev - m_new)
    a_blk = jnp.exp(bm - m_new)
    base = s_prev * a_prev                                                  # (1,1)
    lse = m_new + jnp.log(base + c_total * a_blk)                           # (S,128)

    diff = r - lse
    num_sc[...] += jnp.sum(jnp.sum(diff * e, axis=1, keepdims=True),
                           axis=0, keepdims=True)

    # Carry forward the total sum-of-exp over everything seen so far.
    block_sum = jnp.sum(row_sum, axis=0, keepdims=True)                     # (1,1)
    s_sc[...] = base + block_sum * a_blk
    m_sc[...] = m_new

    @pl.when(step == pl.num_programs(0) - 1)
    def _finish():
        o_ref[...] = num_sc[...]


def coxph_loss(risk_pred, durations, events, block_rows=None):
    """risk_pred: [N], durations: [N], events: [N] -> scalar f32 loss."""
    n = risk_pred.shape[0]

    # TODO(synk): data-dependent argsort by duration (descending) stays in
    # plain JAX; jnp.argsort is stable, so tie ordering may differ from torch.
    order = jnp.argsort(-durations)
    risk_sorted = risk_pred[order].astype(jnp.float32)
    events_sorted = events[order].astype(jnp.float32)

    chunk = 128                               # lane width: natural unit on all chips
    if block_rows is None:
        block_rows = 8 if n <= 4096 else 64   # MXU sublane rows per grid step
    assert block_rows % 8 == 0
    block = block_rows * chunk
    n_pad = ((n + block - 1) // block) * block
    pad = n_pad - n

    # Padding MUST be appended *after* the sort with risk=0, events=0: padded
    # entries then only ever follow real rows (so they never enter a real
    # row's at-risk set) and contribute nothing to the numerator.
    risk_row = jnp.pad(risk_sorted, (0, pad))
    events_row = jnp.pad(events_sorted, (0, pad))
    stacked = jnp.stack([risk_row, events_row]).reshape(2, n_pad // chunk, chunk)

    n_steps = n_pad // block
    num = pl.pallas_call(
        coxph_loss_kernel,
        out_shape=jax.ShapeDtypeStruct((1, 1), jnp.float32),
        grid_spec=pltpu.PrefetchScalarGridSpec(
            num_scalar_prefetch=0,
            grid=(n_steps,),
            in_specs=[pl.BlockSpec((2, block_rows, chunk), lambda i: (0, i, 0))],
            out_specs=pl.BlockSpec((1, 1), lambda i: (0, 0)),
            scratch_shapes=[pltpu.VMEM((1, 1), jnp.float32),             # running max
                            pltpu.VMEM((1, 1), jnp.float32),             # running sum-exp
                            pltpu.VMEM((1, 1), jnp.float32),             # numerator acc
                            pltpu.VMEM((chunk, chunk), jnp.float32),     # tri (resident)
                            pltpu.VMEM((block_rows, block_rows), jnp.float32)],  # low
        ),
        compiler_params=pltpu.CompilerParams(
            # The cross-block prefix carry makes the grid axis sequential.
            dimension_semantics=("arbitrary",),
            vmem_limit_bytes=16 * 1024 * 1024,
        ),
        cost_estimate=pl.CostEstimate(
            flops=2 * n_pad * chunk + 2 * n_pad * block_rows,
            transcendentals=2 * n_pad + 4 * n_steps,
            bytes_accessed=2 * n_pad * 4 + 4,
        ),
    )(stacked)

    # Denominator (torch.sum(events + 1e-8) over the original N entries) and
    # the final divide are trivial XLA ops outside the serial kernel.
    den = jnp.sum(events_sorted) + jnp.float32(n) * jnp.float32(1e-8)
    return -num[0, 0] / den


def coxph_loss_ref(risk_pred, durations, events):
    """Pure-JAX reference reproducing the PyTorch forward."""
    order = jnp.argsort(-durations)
    r = risk_pred[order].astype(jnp.float32)
    e = events[order].astype(jnp.float32)
    n = r.shape[0]
    mask = jnp.arange(n)[None, :] <= jnp.arange(n)[:, None]
    lcse = jax.scipy.special.logsumexp(
        jnp.where(mask, r[None, :], -jnp.inf), axis=1)
    diff = r - lcse
    return -jnp.sum(diff * e) / jnp.sum(e + 1e-8)


if __name__ == "__main__":
    # Small case (single grid step, S=8 multi-sublane block).
    k1, k2, k3 = jax.random.split(jax.random.PRNGKey(0), 3)
    batch = 8
    risk_pred = jax.random.normal(k1, (batch,), dtype=jnp.float32)
    durations = jax.random.uniform(k2, (batch,), dtype=jnp.float32,
                                   minval=0.0, maxval=10.0)
    events = (jax.random.uniform(k3, (batch,)) < 0.5).astype(jnp.float32)

    loss = coxph_loss(risk_pred, durations, events)
    jax.block_until_ready(loss)
    loss_ref = coxph_loss_ref(risk_pred, durations, events)
    assert jnp.allclose(loss, loss_ref, atol=1e-5, rtol=1e-5), (loss, loss_ref)

    # Larger case (multiple grid steps + padding; exercises the resident
    # triangular constants and the online cross-block prefix carry).
    k4, k5, k6 = jax.random.split(jax.random.PRNGKey(0), 3)
    batch2 = 2500                      # -> n_pad = 3072, 3 sequential steps
    risk2 = jax.random.normal(k4, (batch2,), dtype=jnp.float32)
    dur2 = jax.random.uniform(k5, (batch2,), dtype=jnp.float32,
                              minval=0.0, maxval=10.0)
    ev2 = (jax.random.uniform(k6, (batch2,)) < 0.5).astype(jnp.float32)

    loss2 = coxph_loss(risk2, dur2, ev2)
    jax.block_until_ready(loss2)
    loss2_ref = coxph_loss_ref(risk2, dur2, ev2)
    assert jnp.allclose(loss2, loss2_ref, atol=1e-4, rtol=1e-4), (loss2, loss2_ref)

    print("KERNEL_OK")
</pallas_src>

<mosaic_0001>
module attributes {stable_mosaic.version = 11 : i64} {
  func.func @coxph_loss_kernel(%arg0: i32, %arg1: memref<2x8x128xf32, #tpu.memory_space<vmem>>, %arg2: memref<1x1xf32, #tpu.memory_space<vmem>>, %arg3: memref<1x1xf32, #tpu.memory_space<vmem>>, %arg4: memref<1x1xf32, #tpu.memory_space<vmem>>, %arg5: memref<1x1xf32, #tpu.memory_space<vmem>>, %arg6: memref<128x128xf32, #tpu.memory_space<vmem>>, %arg7: memref<8x8xf32, #tpu.memory_space<vmem>>) attributes {dimension_semantics = [#tpu.dimension_semantics<arbitrary>], iteration_bounds = array<i64: 1>, scalar_prefetch = 0 : i64, scratch_operands = 5 : i64, tpu.core_type = #tpu.core_type<tc>, window_params = [{transform_indices = @transform_0, window_bounds = array<i64: 2, 8, 128>}, {pipeline_mode = #tpu.pipeline_mode<synchronous>, transform_indices = @transform_1, window_bounds = array<i64: 1, 1>}]} {
    %c0_i32 = arith.constant 0 : i32
    %0 = arith.cmpi eq, %arg0, %c0_i32 : i32
    %1 = arith.extui %0 : i1 to i32
    %c0_i32_0 = arith.constant 0 : i32
    %2 = arith.cmpi ne, %1, %c0_i32_0 : i32
    scf.if %2 {
      %cst_30 = arith.constant 0xFF800000 : f32
      %56 = vector.broadcast %cst_30 : f32 to vector<1x1xf32>
      %c0_31 = arith.constant 0 : index
      %c0_32 = arith.constant 0 : index
      %57 = vector.load %arg3[%c0_31, %c0_32] : memref<1x1xf32, #tpu.memory_space<vmem>>, vector<1x1xf32>
      tpu.vector_store %arg3[%c0_31, %c0_32], %56 {strides = array<i32>} : memref<1x1xf32, #tpu.memory_space<vmem>>, vector<1x1xf32>,
      %cst_33 = arith.constant 0.000000e+00 : f32
      %58 = vector.broadcast %cst_33 : f32 to vector<1x1xf32>
      %c0_34 = arith.constant 0 : index
      %c0_35 = arith.constant 0 : index
      %59 = vector.load %arg4[%c0_34, %c0_35] : memref<1x1xf32, #tpu.memory_space<vmem>>, vector<1x1xf32>
      tpu.vector_store %arg4[%c0_34, %c0_35], %58 {strides = array<i32>} : memref<1x1xf32, #tpu.memory_space<vmem>>, vector<1x1xf32>,
      %cst_36 = arith.constant 0.000000e+00 : f32
      %60 = vector.broadcast %cst_36 : f32 to vector<1x1xf32>
      %c0_37 = arith.constant 0 : index
      %c0_38 = arith.constant 0 : index
      %61 = vector.load %arg5[%c0_37, %c0_38] : memref<1x1xf32, #tpu.memory_space<vmem>>, vector<1x1xf32>
      tpu.vector_store %arg5[%c0_37, %c0_38], %60 {strides = array<i32>} : memref<1x1xf32, #tpu.memory_space<vmem>>, vector<1x1xf32>,
      %62 = tpu.iota {dimensions = array<i32: 0>} : vector<128x128xi32>
      %63 = tpu.iota {dimensions = array<i32: 1>} : vector<128x128xi32>
      %64 = arith.cmpi sle, %62, %63 : vector<128x128xi32>
      %65 = arith.extui %64 : vector<128x128xi1> to vector<128x128xi32>
      %66 = arith.sitofp %65 : vector<128x128xi32> to vector<128x128xf32>
      %c0_39 = arith.constant 0 : index
      %c0_40 = arith.constant 0 : index
      %67 = vector.load %arg6[%c0_39, %c0_40] : memref<128x128xf32, #tpu.memory_space<vmem>>, vector<128x128xf32>
      tpu.vector_store %arg6[%c0_39, %c0_40], %66 {strides = array<i32>} : memref<128x128xf32, #tpu.memory_space<vmem>>, vector<128x128xf32>,
      %68 = tpu.iota {dimensions = array<i32: 0>} : vector<8x8xi32>
      %69 = tpu.iota {dimensions = array<i32: 1>} : vector<8x8xi32>
      %70 = arith.cmpi slt, %69, %68 : vector<8x8xi32>
      %71 = arith.extui %70 : vector<8x8xi1> to vector<8x8xi32>
      %72 = arith.sitofp %71 : vector<8x8xi32> to vector<8x8xf32>
      %c0_41 = arith.constant 0 : index
      %c0_42 = arith.constant 0 : index
      %73 = vector.load %arg7[%c0_41, %c0_42] : memref<8x8xf32, #tpu.memory_space<vmem>>, vector<8x8xf32>
      tpu.vector_store %arg7[%c0_41, %c0_42], %72 {strides = array<i32>} : memref<8x8xf32, #tpu.memory_space<vmem>>, vector<8x8xf32>,
    } else {
    }
    %c0 = arith.constant 0 : index
    %c0_1 = arith.constant 0 : index
    %c0_2 = arith.constant 0 : index
    %3 = vector.load %arg1[%c0, %c0_1, %c0_2] : memref<2x8x128xf32, #tpu.memory_space<vmem>>, vector<1x8x128xf32>
    %4 = vector.shape_cast %3 : vector<1x8x128xf32> to vector<8x128xf32>
    %c1 = arith.constant 1 : index
    %c0_3 = arith.constant 0 : index
    %c0_4 = arith.constant 0 : index
    %5 = vector.load %arg1[%c1, %c0_3, %c0_4] : memref<2x8x128xf32, #tpu.memory_space<vmem>>, vector<1x8x128xf32>
    %6 = vector.shape_cast %5 : vector<1x8x128xf32> to vector<8x128xf32>
    %cst = arith.constant dense<0xFF800000> : vector<8xf32>
    %7 = vector.multi_reduction <maximumf>, %4, %cst [1] : vector<8x128xf32> to vector<8xf32>
    %8 = vector.shape_cast %7 : vector<8xf32> to vector<8x1xf32>
    %cst_5 = arith.constant dense<0xFF800000> : vector<1xf32>
    %9 = vector.multi_reduction <maximumf>, %8, %cst_5 [0] : vector<8x1xf32> to vector<1xf32>
    %10 = vector.shape_cast %9 : vector<1xf32> to vector<1x1xf32>
    %11 = vector.broadcast %10 : vector<1x1xf32> to vector<8x128xf32>
    %12 = arith.subf %4, %11 : vector<8x128xf32>
    %13 = math.exp %12 : vector<8x128xf32>
    %c0_6 = arith.constant 0 : index
    %c0_7 = arith.constant 0 : index
    %14 = vector.load %arg6[%c0_6, %c0_7] : memref<128x128xf32, #tpu.memory_space<vmem>>, vector<128x128xf32>
    %cst_8 = arith.constant dense<0.000000e+00> : vector<8x128xf32>
    %15 = tpu.matmul %13, %14, %cst_8 {dimension_numbers = #tpu.dot_dimension_numbers<[1], [0], [0], [1], [0, 0, 1, 1], [], []>} : vector<8x128xf32>, vector<128x128xf32>, vector<8x128xf32> -> vector<8x128xf32>
    %cst_9 = arith.constant dense<0.000000e+00> : vector<8xf32>
    %16 = vector.multi_reduction <add>, %13, %cst_9 [1] : vector<8x128xf32> to vector<8xf32>
    %17 = vector.shape_cast %16 : vector<8xf32> to vector<8x1xf32>
    %18 = vector.shape_cast %17 : vector<8x1xf32> to vector<8x1xf32>
    %19 = vector.broadcast %18 : vector<8x1xf32> to vector<8x128xf32>
    %c0_10 = arith.constant 0 : index
    %c0_11 = arith.constant 0 : index
    %20 = vector.load %arg7[%c0_10, %c0_11] : memref<8x8xf32, #tpu.memory_space<vmem>>, vector<8x8xf32>
    %cst_12 = arith.constant dense<0.000000e+00> : vector<8x128xf32>
    %21 = tpu.matmul %20, %19, %cst_12 {dimension_numbers = #tpu.dot_dimension_numbers<[1], [0], [0], [1], [0, 0, 1, 1], [], []>} : vector<8x8xf32>, vector<8x128xf32>, vector<8x128xf32> -> vector<8x128xf32>
    %22 = arith.addf %15, %21 : vector<8x128xf32>
    %c0_13 = arith.constant 0 : index
    %c0_14 = arith.constant 0 : index
    %23 = vector.load %arg3[%c0_13, %c0_14] : memref<1x1xf32, #tpu.memory_space<vmem>>, vector<1x1xf32>
    %c0_15 = arith.constant 0 : index
    %c0_16 = arith.constant 0 : index
    %24 = vector.load %arg4[%c0_15, %c0_16] : memref<1x1xf32, #tpu.memory_space<vmem>>, vector<1x1xf32>
    %25 = arith.maximumf %23, %10 : vector<1x1xf32>
    %26 = arith.subf %23, %25 : vector<1x1xf32>
    %27 = math.exp %26 : vector<1x1xf32>
    %28 = arith.subf %10, %25 : vector<1x1xf32>
    %29 = math.exp %28 : vector<1x1xf32>
    %30 = arith.mulf %24, %27 : vector<1x1xf32>
    %31 = vector.broadcast %29 : vector<1x1xf32> to vector<8x128xf32>
    %32 = arith.mulf %22, %31 : vector<8x128xf32>
    %33 = vector.broadcast %30 : vector<1x1xf32> to vector<8x128xf32>
    %34 = arith.addf %33, %32 : vector<8x128xf32>
    %35 = math.log %34 : vector<8x128xf32>
    %36 = vector.broadcast %25 : vector<1x1xf32> to vector<8x128xf32>
    %37 = arith.addf %36, %35 : vector<8x128xf32>
    %38 = arith.subf %4, %37 : vector<8x128xf32>
    %c0_17 = arith.constant 0 : index
    %c0_18 = arith.constant 0 : index
    %39 = vector.load %arg5[%c0_17, %c0_18] : memref<1x1xf32, #tpu.memory_space<vmem>>, vector<1x1xf32>
    %40 = arith.mulf %38, %6 : vector<8x128xf32>
    %cst_19 = arith.constant dense<0.000000e+00> : vector<8xf32>
    %41 = vector.multi_reduction <add>, %40, %cst_19 [1] : vector<8x128xf32> to vector<8xf32>
    %42 = vector.shape_cast %41 : vector<8xf32> to vector<8x1xf32>
    %cst_20 = arith.constant dense<0.000000e+00> : vector<1xf32>
    %43 = vector.multi_reduction <add>, %42, %cst_20 [0] : vector<8x1xf32> to vector<1xf32>
    %44 = vector.shape_cast %43 : vector<1xf32> to vector<1x1xf32>
    %45 = arith.addf %39, %44 : vector<1x1xf32>
    %c0_21 = arith.constant 0 : index
    %c0_22 = arith.constant 0 : index
    %46 = vector.load %arg5[%c0_21, %c0_22] : memref<1x1xf32, #tpu.memory_space<vmem>>, vector<1x1xf32>
    tpu.vector_store %arg5[%c0_21, %c0_22], %45 {strides = array<i32>} : memref<1x1xf32, #tpu.memory_space<vmem>>, vector<1x1xf32>,
    %cst_23 = arith.constant dense<0.000000e+00> : vector<1xf32>
    %47 = vector.multi_reduction <add>, %17, %cst_23 [0] : vector<8x1xf32> to vector<1xf32>
    %48 = vector.shape_cast %47 : vector<1xf32> to vector<1x1xf32>
    %49 = arith.mulf %48, %29 : vector<1x1xf32>
    %50 = arith.addf %30, %49 : vector<1x1xf32>
    %c0_24 = arith.constant 0 : index
    %c0_25 = arith.constant 0 : index
    %51 = vector.load %arg4[%c0_24, %c0_25] : memref<1x1xf32, #tpu.memory_space<vmem>>, vector<1x1xf32>
    tpu.vector_store %arg4[%c0_24, %c0_25], %50 {strides = array<i32>} : memref<1x1xf32, #tpu.memory_space<vmem>>, vector<1x1xf32>,
    %c0_26 = arith.constant 0 : index
    %c0_27 = arith.constant 0 : index
    %52 = vector.load %arg3[%c0_26, %c0_27] : memref<1x1xf32, #tpu.memory_space<vmem>>, vector<1x1xf32>
    tpu.vector_store %arg3[%c0_26, %c0_27], %25 {strides = array<i32>} : memref<1x1xf32, #tpu.memory_space<vmem>>, vector<1x1xf32>,
    %c0_i32_28 = arith.constant 0 : i32
    %53 = arith.cmpi eq, %arg0, %c0_i32_28 : i32
    %54 = arith.extui %53 : i1 to i32
    %c0_i32_29 = arith.constant 0 : i32
    %55 = arith.cmpi ne, %54, %c0_i32_29 : i32
    scf.if %55 {
      %c0_30 = arith.constant 0 : index
      %c0_31 = arith.constant 0 : index
      %56 = vector.load %arg5[%c0_30, %c0_31] : memref<1x1xf32, #tpu.memory_space<vmem>>, vector<1x1xf32>
      %c0_32 = arith.constant 0 : index
      %c0_33 = arith.constant 0 : index
      %57 = vector.load %arg2[%c0_32, %c0_33] : memref<1x1xf32, #tpu.memory_space<vmem>>, vector<1x1xf32>
      tpu.vector_store %arg2[%c0_32, %c0_33], %56 {strides = array<i32>} : memref<1x1xf32, #tpu.memory_space<vmem>>, vector<1x1xf32>,
    } else {
    }
    return
  }
  func.func @transform_0(%arg0: i32) -> (i32, i32, i32) {
    %c0_i32 = arith.constant 0 : i32
    %c0_i32_0 = arith.constant 0 : i32
    %c0_i32_1 = arith.constant 0 : i32
    return %c0_i32, %arg0, %c0_i32_0 : i32, i32, i32
  }
  func.func @transform_1(%arg0: i32) -> (i32, i32) {
    %c0_i32 = arith.constant 0 : i32
    %c0_i32_0 = arith.constant 0 : i32
    %c0_i32_1 = arith.constant 0 : i32
    return %c0_i32, %c0_i32_0 : i32, i32
  }
}

</mosaic_0001>

<bundles_post_ra>
// kernel: tpu_custom_call.1
= control target key start
LH: loop header
LB: loop body
LE: loop exit
PB: predicated region body
PF: predicated region fallthrough
CT: control target
= control target key end

     0   :  { %6 = vsyncpa [#allocation8], 0  ;;  %s671_s0 = inlined_call_operand.hbm [shape: f32[2,8,128], index: 0, kind: input, shape index: {}]   ;;  %s672_s1 = inlined_call_operand.hbm [shape: f32[1,1], index: 1, kind: output, shape index: {}]  }
   0x1   :  { %7 = vsyncpa [#allocation9], 0  ;;  %s568_s6 = smov [#allocation7]   ;;  %s520_s10 = scalar_lea.hbm %s671_s0, 256 }
   0x2   :  { %s13_s7 = sshll.u32 %s568_s6, 4  ;;  %p521_p0 = scmp.ne.s32.totalorder %s671_s0, %s520_s10  ;;  %s14_s7 = int_to_ptr.vmem [resolvable:$true] %s13_s7 }
   0x3   :  { %p524_p1 = scmp.lt.u32.totalorder %s520_s10, %s671_s0 }
   0x5   :  { %p526_p2 = pnand %p524_p1, %p521_p0 }
   0x7   :  { %529 = shalt.err (!%p526_p2)
}
   0x8   :  { %s530_s15 = scalar_lea.vmem %s14_s7, 256  ;;  %p535_p4 = scmp.lt.s32.totalorder %s14_s7, %s14_s7 }
   0x9   :  { %p531_p3 = scmp.ne.s32.totalorder %s14_s7, %s530_s15  ;;  %p536_p5 = scmp.lt.s32.totalorder %s530_s15, %s530_s15 }
   0xb   :  { %p537_p6 = por %p536_p5, %p535_p4 }
   0xd   :  { %p538_p7 = pnand %p537_p6, %p531_p3 }
   0xf   :  { %541 = shalt.err (!%p538_p7)
}
  0x10   :  { %s569_s16 = smov 128   ;;  %s570_s17 = smov 8  }
  0x11   :  { %19 = dma.hbm_to_vmem [thread:$0]  %s671_s0, 256, %s14_s7, [#allocation8], %s569_s16, %s569_s16, %s570_s17  }
  0x12   :  { %564 = dma.done.wait [#allocation8], 256  }
  0x13   :  { %565 = vsyncadd [#allocation8], 4294967040  ;;  %v31_v0 = vlaneseq  ;;  %vm27_vm0 = vcmask 0   ;;  %v571_v1 = vmov 0.0|0.0   ;;  %v572_v4 = vmov -inf   ;;  %v610_v6 = vld [vmem:[#allocation7] sm:$0xff] }
  0x14   :  { %475 = vmatprep.subr.bf16.mxu0 %v571_v1  ;;  %28 = vst.msk [vmem:[#allocation2] sm:$0x1] %vm27_vm0, %v572_v4  ;;  %122 = vmax.xlane.f32.xlu0 %v610_v6  ;;  %v573_v7 = vmov 1.0|1.0   ;;  %v574_v22 = vmov 0.0   ;;  %v576_v23 = vmov 0  }
  0x15   :  { %v601_v2 = vshrl.u32 %v31_v0, 7  ;;  %v603_v3 = vand.u32 127, %v31_v0  ;;  %29 = vst.msk [vmem:[#allocation3] sm:$0x1] %vm27_vm0, %v574_v22  ;;  %30 = vst.msk [vmem:[#allocation4] sm:$0x1] %vm27_vm0, %v574_v22  ;;  %435 = vmatprep.subr.mxu1 %v574_v22  ;;  %510 = vset.pattern.permute.xlu1 %v576_v23 }
  0x16   :  { %511 = vset.pattern.permute.xlu0 %v576_v23  ;;  %s577_s0 = smov [#allocation10]  }
  0x17   :  { %v33_v5 = vadd.s32 8, %v601_v2  ;;  %vm50_vm1 = vcmp.le.s32.totalorder %v601_v2, %v603_v3  ;;  %v34_v8 = vadd.s32 16, %v601_v2  ;;  %v35_v9 = vadd.s32 24, %v601_v2  ;;  %s373_s20 = sshll.u32 %s577_s0, 4  ;;  %s374_s20 = int_to_ptr.vmem [resolvable:$true] %s373_s20 }
  0x18   :  { %v36_v10 = vadd.s32 32, %v601_v2  ;;  %v37_v11 = vadd.s32 40, %v601_v2  ;;  %v38_v12 = vadd.s32 48, %v601_v2  ;;  %v39_v13 = vadd.s32 56, %v601_v2  ;;  %s542_s21 = scalar_lea.vmem %s374_s20, 16  ;;  %s546_s22 = scalar_lea.vmem %s374_s20, 32 }
  0x19   :  { %vm51_vm2 = vcmp.le.s32.totalorder %v33_v5, %v603_v3  ;;  %vm52_vm4 = vcmp.le.s32.totalorder %v34_v8, %v603_v3  ;;  %vm53_vm5 = vcmp.le.s32.totalorder %v35_v9, %v603_v3  ;;  %v40_v14 = vadd.s32 64, %v601_v2  ;;  %v121_v9 = vld [vmem:[#allocation7 + $0x8] sm:$0xff]  ;;  %p543_p8 = scmp.ne.s32.totalorder %s374_s20, %s542_s21  ;;  %p547_p9 = scmp.lt.s32.totalorder %s374_s20, %s374_s20 }
  0x1a   :  { %vm476_vm3 = vmpackc.low %vm51_vm2, %vm50_vm1  ;;  %vm54_vm7 = vcmp.le.s32.totalorder %v36_v10, %v603_v3  ;;  %vm55_vm8 = vcmp.le.s32.totalorder %v37_v11, %v603_v3  ;;  %vm56_vm10 = vcmp.le.s32.totalorder %v38_v12, %v603_v3  ;;  %vm57_vm11 = vcmp.le.s32.totalorder %v39_v13, %v603_v3  ;;  %p548_p10 = scmp.lt.s32.totalorder %s546_s22, %s542_s21 }
  0x1b   :  { %477 = vmatpush3.bf16.msk.msra.mxu0 %vm476_vm3, %v573_v7  ;;  %vm479_vm6 = vmpackc.low %vm53_vm5, %vm52_vm4  ;;  %v41_v15 = vadd.s32 72, %v601_v2  ;;  %vm58_vm13 = vcmp.le.s32.totalorder %v40_v14, %v603_v3  ;;  %v42_v16 = vadd.s32 80, %v601_v2  ;;  %v43_v17 = vadd.s32 88, %v601_v2  ;;  %v296_v30 = vld [vmem:[#allocation2] sm:$0x1] }
  0x1c   :  { %478 = vmatprep.subr.bf16.mxu0 %v571_v1  ;;  %vm482_vm9 = vmpackc.low %vm55_vm8, %vm54_vm7  ;;  %v44_v18 = vadd.s32 96, %v601_v2  ;;  %v45_v19 = vadd.s32 104, %v601_v2  ;;  %v46_v20 = vadd.s32 112, %v601_v2  ;;  %v47_v21 = vadd.s32 120, %v601_v2  ;;  %v297_v40 = vld [vmem:[#allocation3] sm:$0x1]  ;;  %p549_p11 = por %p548_p10, %p547_p9 }
  0x1d   :  { %vm485_vm12 = vmpackc.low %vm57_vm11, %vm56_vm10  ;;  %vm59_vm14 = vcmp.le.s32.totalorder %v41_v15, %v603_v3  ;;  %vm60_vm1 = vcmp.le.s32.totalorder %v42_v16, %v603_v3  ;;  %vm61_vm2 = vcmp.le.s32.totalorder %v43_v17, %v603_v3  ;;  %v309_v42 = vsub.s32 0, %v601_v2 }
  0x1e   :  { %vm488_vm15 = vmpackc.low %vm59_vm14, %vm58_vm13  ;;  %vm62_vm4 = vcmp.le.s32.totalorder %v44_v18, %v603_v3  ;;  %vm63_vm5 = vcmp.le.s32.totalorder %v45_v19, %v603_v3  ;;  %vm64_vm7 = vcmp.le.s32.totalorder %v46_v20, %v603_v3  ;;  %vm65_vm8 = vcmp.le.s32.totalorder %v47_v21, %v603_v3  ;;  %v339_v18 = vld [vmem:[#allocation4] sm:$0x1]  ;;  %p550_p12 = pnand %p549_p11, %p543_p8 }
  0x1f   :  { %480 = vmatpush3.bf16.msk.msra.mxu0 %vm479_vm6, %v573_v7  ;;  %vm491_vm3 = vmpackc.low %vm61_vm2, %vm60_vm1  ;;  %vm114_vm11 = vcmp.lt.s32.totalorder %v603_v3, %v601_v2 }
  0x20   :  { %481 = vmatprep.subr.bf16.mxu0 %v571_v1  ;;  %vm494_vm6 = vmpackc.low %vm63_vm5, %vm62_vm4  ;;  %v398_v47 = vsel %vm114_vm11, 1.0, %v574_v22 }
  0x21   :  { %vm497_vm10 = vmpackc.low %vm65_vm8, %vm64_vm7 }
  0x23   :  { %483 = vmatpush3.bf16.msk.msra.mxu0 %vm482_vm9, %v573_v7  ;;  %vm575_vm9 = vmmov 0  }
  0x24   :  { %484 = vmatprep.subr.bf16.mxu0 %v571_v1  ;;  %472 = vmatprep.mubr.msk.f32.mxu0 %vm575_vm9, %v574_v22 }
  0x25   :  { %437 = vmatprep.mubr.msk.f32.mxu1 %vm575_vm9, %v574_v22 }
  0x27   :  { %486 = vmatpush3.bf16.msk.msra.mxu0 %vm485_vm12, %v573_v7  ;;  %vm117_vm12 = vcmask 64512  }
  0x28   :  { %487 = vmatprep.subr.bf16.mxu0 %v571_v1  ;;  %118 = vst.msk [vmem:[#allocation6] sm:$0xff] %vm117_vm12, %v398_v47 }
  0x2b   :  { %489 = vmatpush3.bf16.msk.msra.mxu0 %vm488_vm15, %v573_v7 }
  0x2c   :  { %490 = vmatprep.subr.bf16.mxu0 %v571_v1 }
  0x2f   :  { %492 = vmatpush3.bf16.msk.msra.mxu0 %vm491_vm3, %v573_v7  ;;  %v151_v49 = vld [vmem:[#allocation6] sm:$0xff] }
  0x30   :  { %493 = vmatprep.subr.bf16.mxu0 %v571_v1 }
  0x33   :  { %495 = vmatpush3.bf16.msk.msra.mxu0 %vm494_vm6, %v573_v7 }
  0x34   :  { %496 = vmatprep.subr.bf16.mxu0 %v571_v1 }
  0x37   :  { %498 = vmatpush3.bf16.msk.msra.mxu0 %vm497_vm10, %v573_v7 }
  0xa1   :  { %v123_v24 = vpop.xlane.xlu0 %122 }
  0xa2   :  { %v124_v25 = vrot.slane %v123_v24, 4 }
  0xa4   :  { %v125_v26 = vmax.f32 %v123_v24, %v124_v25 }
  0xa6   :  { %v126_v27 = vrot.slane %v125_v26, 2 }
  0xa8   :  { %v127_v28 = vmax.f32 %v125_v26, %v126_v27 }
  0xaa   :  { %v128_v29 = vrot.slane %v127_v28, 1 }
  0xac   :  { %v129_v31 = vmax.f32 %v127_v28, %v128_v29 }
  0xae   :  { %v130_v32 = vsub.f32 %v610_v6, %v129_v31  ;;  %v298_v33 = vmax.f32 %v296_v30, %v129_v31 }
  0xb0   :  { %v131_v34 = vmul.f32 1.442695, %v130_v32  ;;  %v299_v35 = vsub.f32 %v296_v30, %v298_v33  ;;  %v302_v36 = vsub.f32 %v129_v31, %v298_v33  ;;  %361 = vst.msk [vmem:[#allocation2] sm:$0x1] %vm27_vm0, %v298_v33  ;;  %v332_v48 = vrot.slane %v298_v33, %v309_v42 }
  0xb2   :  { %v300_v37 = vmul.f32 1.442695, %v299_v35  ;;  %v303_v38 = vmul.f32 1.442695, %v302_v36  ;;  %512 = vpow2.f32 %v131_v34 }
  0xb4   :  { %514 = vpow2.f32 %v300_v37 }
  0xb5   :  { %516 = vpow2.f32 %v303_v38 }
  0xbc   :  { %v513_v39 = vpop.eup %512 }
  0xbd   :  { %149 = vadd.xlane.f32.xlu0 %v513_v39  ;;  %473 = vmatmul.mubr.f32.vlgmr.msra.gmra.mrb[0].mxu0 %v513_v39 }
  0xbe   :  { %v515_v41 = vpop.eup %514 }
  0xbf   :  { %v517_v43 = vpop.eup %516  ;;  %v305_v45 = vmul.f32 %v515_v41, %v297_v40 }
  0xc0   :  { %v310_v44 = vrot.slane %v517_v43, %v309_v42 }
  0xc1   :  { %v320_v46 = vrot.slane %v305_v45, %v309_v42 }
  0xc2   :  { %312 = vperm.xlu1 %510, %v310_v44  }
  0xc6   :  { %322 = vperm.xlu1 %510, %v320_v46  }
  0xd3   :  { %334 = vperm.xlu0 %511, %v332_v48  }
 0x141   :  { %v313_v61 = vpop.permute.xlu1 %312 }
 0x145   :  { %v323_v2 = vpop.permute.xlu1 %322 }
 0x14a   :  { %v150_v50 = vpop.xlane.xlu0 %149 }
 0x14b   :  { %v352_v51 = vrot.slane %v150_v50, 4  ;;  %436 = vmatpush3.msra.mxu1 %v150_v50 }
 0x14c   :  { %438 = vmatmul.mubr.msk.f32.vlgmr.msra.gmra.mrb[0].mxu1 %vm117_vm12, %v151_v49 }
 0x14d   :  { %v353_v52 = vadd.f32 %v352_v51, %v150_v50 }
 0x14f   :  { %v354_v53 = vrot.slane %v353_v52, 2 }
 0x151   :  { %v355_v54 = vadd.f32 %v354_v53, %v353_v52 }
 0x152   :  { %v335_v7 = vpop.permute.xlu0 %334 }
 0x153   :  { %v356_v55 = vrot.slane %v355_v54, 1 }
 0x155   :  { %v357_v56 = vadd.f32 %v356_v55, %v355_v54 }
 0x157   :  { %v358_v57 = vmul.f32 %v517_v43, %v357_v56 }
 0x159   :  { %v359_v58 = vadd.f32 %v358_v57, %v305_v45 }
 0x15b   :  { %360 = vst.msk [vmem:[#allocation3] sm:$0x1] %vm27_vm0, %v359_v58 }
 0x190   :  { %v292_v59 = vpop.f32.mrb[0].mxu0 }
 0x191   :  { %v474_v60 = vpop.f32.mrb[1].mxu0 }
 0x21f   :  { %v222_v62 = vpop.f32.mrb[0].mxu1 }
 0x220   :  { %v293_v63 = vadd.f32 %v292_v59, %v222_v62  ;;  %v439_v0 = vpop.f32.mrb[1].mxu1 }
 0x222   :  { %v315_v1 = vmul.f32 %v313_v61, %v293_v63 }
 0x224   :  { %v325_v3 = vadd.f32 %v323_v2, %v315_v1 }
 0x226   :  { %518 = vlog2.f32 %v325_v3 }
 0x230   :  { %v519_v4 = vpop.eup %518 }
 0x231   :  { %v327_v5 = vmul.f32 0.6931472, %v519_v4 }
 0x233   :  { %v337_v8 = vadd.f32 %v335_v7, %v327_v5 }
 0x235   :  { %v338_v10 = vsub.f32 %v610_v6, %v337_v8 }
 0x237   :  { %v340_v11 = vmul.f32 %v338_v10, %v121_v9 }
 0x239   :  { %341 = vadd.xlane.f32.xlu1 %v340_v11 }
 0x2c6   :  { %v342_v12 = vpop.xlane.xlu1 %341 }
 0x2c7   :  { %v343_v13 = vrot.slane %v342_v12, 4 }
 0x2c9   :  { %v344_v14 = vadd.f32 %v343_v13, %v342_v12 }
 0x2cb   :  { %v345_v15 = vrot.slane %v344_v14, 2 }
 0x2cd   :  { %v346_v16 = vadd.f32 %v345_v15, %v344_v14 }
 0x2cf   :  { %v347_v17 = vrot.slane %v346_v16, 1 }
 0x2d1   :  { %v348_v19 = vadd.f32 %v347_v17, %v346_v16 }
 0x2d3   :  { %v349_v20 = vadd.f32 %v348_v19, %v339_v18 }
 0x2d5   :  { %351 = vst.msk [vmem:[#allocation4] sm:$0x1] %vm27_vm0, %v349_v20 }
 0x2dc   :  { %v365_v21 = vld [vmem:[#allocation4] sm:$0x1] }
 0x2dd   :  { %366 = vst.msk [vmem:[#allocation10] sm:$0x1] %vm27_vm0, %v365_v21 }
 0x2de   :  { %553 = shalt.err (!%p550_p12)
}
 0x2df   :  { %s554_s25 = scalar_lea.hbm %s672_s1, 16 }
 0x2e0   :  { %p555_p13 = scmp.ne.s32.totalorder %s672_s1, %s554_s25  ;;  %p558_p0 = scmp.lt.u32.totalorder %s554_s25, %s672_s1 }
 0x2e2   :  { %p560_p1 = pnand %p558_p0, %p555_p13 }
 0x2e4   :  { %563 = shalt.err (!%p560_p1)
}
 0x2e5   :  { %376 = dma.vmem_to_hbm [thread:$0]  %s374_s20, 16, %s672_s1, [#allocation9]  }
 0x2e6   :  { %566 = dma.done.wait [#allocation9], 16  }
 0x2e7   :  { %567 = vsyncadd [#allocation9], 4294967280 }
 0x2e8   :  { %380 = vsyncpa [#allocation8], 1 }
 0x2e9   :  { %381 = vsyncpa [#allocation9], 1 }

</bundles_post_ra>
